<compile_context>
chip_gen: v7x
topology: tpu7x:2x2x1
jax: 0.10.0
libtpu: 0.0.40
codegen_flags: <defaults>
</compile_context>

<pallas_src>
import jax
import jax.numpy as jnp
from jax.experimental import pallas as pl
from jax.experimental.pallas import tpu as pltpu


LEAKY_SLOPE = 0.01  # nn.LeakyReLU default negative_slope


def _leaky_relu(x):
    return jnp.where(x > 0, x, LEAKY_SLOPE * x)


def mlp_kernel(x_ref, w1_ref, b1_ref, w2_ref, b2_ref, w3_ref, b3_ref, o_ref):
    x = x_ref[...]                                                      # (TB, D)
    h1 = jnp.dot(x, w1_ref[...], preferred_element_type=jnp.float32)    # MXU: (TB, D//2)
    h1 = _leaky_relu(h1 + b1_ref[...])                                  # VPU
    h2 = jnp.dot(h1, w2_ref[...], preferred_element_type=jnp.float32)   # MXU: (TB, D//4)
    h2 = _leaky_relu(h2 + b2_ref[...])                                  # VPU
    # Final layer (out_features == 1): VPU multiply + XLU lane reduce instead
    # of a degenerate N=1 MXU pass. w3_ref is a (1, D//4) row; b3 is an SMEM scalar.
    o = jnp.sum(h2 * w3_ref[...], axis=-1, keepdims=True) + b3_ref[0]   # (TB, 1)
    o_ref[...] = o


def _round_up(a, b):
    return (a + b - 1) // b * b


def _choose_tile_batch(batch, d):
    # Large tiles (>=1024 rows) are needed to approach the HBM roofline, but
    # cap the double-buffered x block at ~4 MiB/buffer so the kernel stays
    # comfortably inside v7x's 32 MiB scoped VMEM regardless of input_dim.
    cap = max(8, ((4 * 1024 * 1024) // (4 * max(d, 1))) // 8 * 8)
    tb = min(4096, cap)
    if batch < tb:
        tb = max(8, _round_up(batch, 8))
    return tb


def mymodel_forward(x, params, *, tile_batch=None):
    """x: (batch, input_dim) float32 -> (batch,) float32, matching net(x).squeeze(1)."""
    w1, b1, w2, b2, w3, b3 = params
    batch, d = x.shape
    d1 = w1.shape[1]
    d2 = w2.shape[1]

    tb = tile_batch if tile_batch is not None else _choose_tile_batch(batch, d)
    grid = (pl.cdiv(batch, tb),)   # boundary block is padded on read / masked on write

    w3_row = w3.reshape(1, d2)     # (d2, 1) -> (1, d2): broadcast row for the VPU epilogue
    b3_s = b3.reshape(1)           # scalar final bias -> SMEM

    out = pl.pallas_call(
        mlp_kernel,
        out_shape=jax.ShapeDtypeStruct((batch, 1), jnp.float32),
        grid=grid,
        in_specs=[
            # x: streamed over the batch grid (auto double-buffered by Pallas).
            pl.BlockSpec((tb, d), lambda i: (i, 0)),
            # Weights/biases: full blocks with constant index_map -> VMEM-resident.
            pl.BlockSpec((d, d1), lambda i: (0, 0)),
            pl.BlockSpec((1, d1), lambda i: (0, 0)),
            pl.BlockSpec((d1, d2), lambda i: (0, 0)),
            pl.BlockSpec((1, d2), lambda i: (0, 0)),
            pl.BlockSpec((1, d2), lambda i: (0, 0)),
            # Final-layer bias as a scalar in SMEM (avoids a padded (1,1) vreg tile).
            pl.BlockSpec(memory_space=pltpu.MemorySpace.SMEM),
        ],
        out_specs=pl.BlockSpec((tb, 1), lambda i: (i, 0)),
        compiler_params=pltpu.CompilerParams(
            dimension_semantics=("parallel",),   # shard batch tiles across TCs on v7x
            vmem_limit_bytes=32 * 1024 * 1024,   # explicit budget, safe on v5e/v6e/v7x
        ),
    )(x, w1, b1, w2, b2, w3_row, b3_s)
    return out[:, 0]  # squeeze(1) — glue outside the kernel


def init_params(key, input_dim):
    """Deterministic init with the same shapes as the PyTorch module."""
    d1, d2 = input_dim // 2, input_dim // 4
    ks = jax.random.split(key, 6)

    def lin(kw, kb, fan_in, fan_out):
        # PyTorch Linear default: U(-1/sqrt(fan_in), 1/sqrt(fan_in))
        bound = 1.0 / jnp.sqrt(jnp.float32(fan_in))
        w = jax.random.uniform(kw, (fan_in, fan_out), jnp.float32, -bound, bound)
        b = jax.random.uniform(kb, (1, fan_out), jnp.float32, -bound, bound)
        return w, b

    w1, b1 = lin(ks[0], ks[1], input_dim, d1)
    w2, b2 = lin(ks[2], ks[3], d1, d2)
    w3, b3 = lin(ks[4], ks[5], d2, 1)
    return (w1, b1, w2, b2, w3, b3)


def reference_forward(x, params):
    """Plain-JAX reference for correctness checking."""
    w1, b1, w2, b2, w3, b3 = params
    h = _leaky_relu(x @ w1 + b1)
    h = _leaky_relu(h @ w2 + b2)
    return (h @ w3 + b3)[:, 0]


if __name__ == "__main__":
    key = jax.random.PRNGKey(0)
    k_x, k_p, k_x2 = jax.random.split(key, 3)

    input_dim = 32          # layers: 32 -> 16 -> 8 -> 1
    batch = 8

    x = jax.random.normal(k_x, (batch, input_dim), dtype=jnp.float32)
    params = init_params(k_p, input_dim)

    # Single-tile path.
    y = mymodel_forward(x, params)
    jax.block_until_ready(y)
    y_ref = reference_forward(x, params)
    assert y.shape == (batch,)
    assert jnp.allclose(y, y_ref, atol=1e-5, rtol=1e-5)

    # Multi-tile path: several grid steps + uneven boundary block
    # (mirrors config batch_size=275).
    batch2 = 275
    x2 = jax.random.normal(k_x2, (batch2, input_dim), dtype=jnp.float32)
    y2 = mymodel_forward(x2, params, tile_batch=128)
    jax.block_until_ready(y2)
    y2_ref = reference_forward(x2, params)
    assert y2.shape == (batch2,)
    assert jnp.allclose(y2, y2_ref, atol=1e-5, rtol=1e-5)

    print("KERNEL_OK")
</pallas_src>

<mosaic_0001>
module attributes {stable_mosaic.version = 11 : i64} {
  func.func @mlp_kernel(%arg0: i32, %arg1: memref<8x32xf32, #tpu.memory_space<vmem>>, %arg2: memref<32x16xf32, #tpu.memory_space<vmem>>, %arg3: memref<1x16xf32, #tpu.memory_space<vmem>>, %arg4: memref<16x8xf32, #tpu.memory_space<vmem>>, %arg5: memref<1x8xf32, #tpu.memory_space<vmem>>, %arg6: memref<1x8xf32, #tpu.memory_space<vmem>>, %arg7: memref<1xf32, #tpu.memory_space<smem>>, %arg8: memref<8x1xf32, #tpu.memory_space<vmem>>) attributes {dimension_semantics = [#tpu.dimension_semantics<parallel>], iteration_bounds = array<i64: 1>, scalar_prefetch = 0 : i64, scratch_operands = 0 : i64, tpu.core_type = #tpu.core_type<tc>, window_params = [{transform_indices = @transform_0, window_bounds = array<i64: 8, 32>}, {pipeline_mode = #tpu.pipeline_mode<synchronous>, transform_indices = @transform_1, window_bounds = array<i64: 32, 16>}, {pipeline_mode = #tpu.pipeline_mode<synchronous>, transform_indices = @transform_2, window_bounds = array<i64: 1, 16>}, {pipeline_mode = #tpu.pipeline_mode<synchronous>, transform_indices = @transform_3, window_bounds = array<i64: 16, 8>}, {pipeline_mode = #tpu.pipeline_mode<synchronous>, transform_indices = @transform_4, window_bounds = array<i64: 1, 8>}, {pipeline_mode = #tpu.pipeline_mode<synchronous>, transform_indices = @transform_5, window_bounds = array<i64: 1, 8>}, {transform_indices = @transform_6, window_bounds = array<i64: 1>}, {transform_indices = @transform_7, window_bounds = array<i64: 8, 1>}]} {
    %c0 = arith.constant 0 : index
    %c0_0 = arith.constant 0 : index
    %0 = vector.load %arg1[%c0, %c0_0] : memref<8x32xf32, #tpu.memory_space<vmem>>, vector<8x32xf32>
    %c0_1 = arith.constant 0 : index
    %c0_2 = arith.constant 0 : index
    %1 = vector.load %arg2[%c0_1, %c0_2] : memref<32x16xf32, #tpu.memory_space<vmem>>, vector<32x16xf32>
    %cst = arith.constant dense<0.000000e+00> : vector<8x16xf32>
    %2 = tpu.matmul %0, %1, %cst {dimension_numbers = #tpu.dot_dimension_numbers<[1], [0], [0], [1], [0, 0, 1, 1], [], []>} : vector<8x32xf32>, vector<32x16xf32>, vector<8x16xf32> -> vector<8x16xf32>
    %c0_3 = arith.constant 0 : index
    %c0_4 = arith.constant 0 : index
    %3 = vector.load %arg3[%c0_3, %c0_4] : memref<1x16xf32, #tpu.memory_space<vmem>>, vector<1x16xf32>
    %4 = vector.broadcast %3 : vector<1x16xf32> to vector<8x16xf32>
    %5 = arith.addf %2, %4 : vector<8x16xf32>
    %cst_5 = arith.constant 0.000000e+00 : f32
    %6 = vector.broadcast %cst_5 : f32 to vector<8x16xf32>
    %7 = arith.cmpf ogt, %5, %6 : vector<8x16xf32>
    %cst_6 = arith.constant 0.00999999977 : f32
    %8 = vector.broadcast %cst_6 : f32 to vector<8x16xf32>
    %9 = arith.mulf %8, %5 : vector<8x16xf32>
    %10 = arith.select %7, %5, %9 : vector<8x16xi1>, vector<8x16xf32>
    %c0_7 = arith.constant 0 : index
    %c0_8 = arith.constant 0 : index
    %11 = vector.load %arg4[%c0_7, %c0_8] : memref<16x8xf32, #tpu.memory_space<vmem>>, vector<16x8xf32>
    %cst_9 = arith.constant dense<0.000000e+00> : vector<8x8xf32>
    %12 = tpu.matmul %10, %11, %cst_9 {dimension_numbers = #tpu.dot_dimension_numbers<[1], [0], [0], [1], [0, 0, 1, 1], [], []>} : vector<8x16xf32>, vector<16x8xf32>, vector<8x8xf32> -> vector<8x8xf32>
    %c0_10 = arith.constant 0 : index
    %c0_11 = arith.constant 0 : index
    %13 = vector.load %arg5[%c0_10, %c0_11] : memref<1x8xf32, #tpu.memory_space<vmem>>, vector<1x8xf32>
    %14 = vector.broadcast %13 : vector<1x8xf32> to vector<8x8xf32>
    %15 = arith.addf %12, %14 : vector<8x8xf32>
    %cst_12 = arith.constant 0.000000e+00 : f32
    %16 = vector.broadcast %cst_12 : f32 to vector<8x8xf32>
    %17 = arith.cmpf ogt, %15, %16 : vector<8x8xf32>
    %cst_13 = arith.constant 0.00999999977 : f32
    %18 = vector.broadcast %cst_13 : f32 to vector<8x8xf32>
    %19 = arith.mulf %18, %15 : vector<8x8xf32>
    %20 = arith.select %17, %15, %19 : vector<8x8xi1>, vector<8x8xf32>
    %c0_14 = arith.constant 0 : index
    %c0_15 = arith.constant 0 : index
    %21 = vector.load %arg6[%c0_14, %c0_15] : memref<1x8xf32, #tpu.memory_space<vmem>>, vector<1x8xf32>
    %22 = vector.broadcast %21 : vector<1x8xf32> to vector<8x8xf32>
    %23 = arith.mulf %20, %22 : vector<8x8xf32>
    %cst_16 = arith.constant dense<0.000000e+00> : vector<8xf32>
    %24 = vector.multi_reduction <add>, %23, %cst_16 [1] : vector<8x8xf32> to vector<8xf32>
    %25 = vector.shape_cast %24 : vector<8xf32> to vector<8x1xf32>
    %c0_17 = arith.constant 0 : index
    %26 = memref.load %arg7[%c0_17] : memref<1xf32, #tpu.memory_space<smem>>
    %27 = vector.broadcast %26 : f32 to vector<8x1xf32>
    %28 = arith.addf %25, %27 : vector<8x1xf32>
    %c0_18 = arith.constant 0 : index
    %c0_19 = arith.constant 0 : index
    %29 = vector.load %arg8[%c0_18, %c0_19] : memref<8x1xf32, #tpu.memory_space<vmem>>, vector<8x1xf32>
    tpu.vector_store %arg8[%c0_18, %c0_19], %28 {strides = array<i32>} : memref<8x1xf32, #tpu.memory_space<vmem>>, vector<8x1xf32>,
    return
  }
  func.func @transform_0(%arg0: i32) -> (i32, i32) {
    %c0_i32 = arith.constant 0 : i32
    %c0_i32_0 = arith.constant 0 : i32
    return %arg0, %c0_i32 : i32, i32
  }
  func.func @transform_1(%arg0: i32) -> (i32, i32) {
    %c0_i32 = arith.constant 0 : i32
    %c0_i32_0 = arith.constant 0 : i32
    %c0_i32_1 = arith.constant 0 : i32
    return %c0_i32, %c0_i32_0 : i32, i32
  }
  func.func @transform_2(%arg0: i32) -> (i32, i32) {
    %c0_i32 = arith.constant 0 : i32
    %c0_i32_0 = arith.constant 0 : i32
    %c0_i32_1 = arith.constant 0 : i32
    return %c0_i32, %c0_i32_0 : i32, i32
  }
  func.func @transform_3(%arg0: i32) -> (i32, i32) {
    %c0_i32 = arith.constant 0 : i32
    %c0_i32_0 = arith.constant 0 : i32
    %c0_i32_1 = arith.constant 0 : i32
    return %c0_i32, %c0_i32_0 : i32, i32
  }
  func.func @transform_4(%arg0: i32) -> (i32, i32) {
    %c0_i32 = arith.constant 0 : i32
    %c0_i32_0 = arith.constant 0 : i32
    %c0_i32_1 = arith.constant 0 : i32
    return %c0_i32, %c0_i32_0 : i32, i32
  }
  func.func @transform_5(%arg0: i32) -> (i32, i32) {
    %c0_i32 = arith.constant 0 : i32
    %c0_i32_0 = arith.constant 0 : i32
    %c0_i32_1 = arith.constant 0 : i32
    return %c0_i32, %c0_i32_0 : i32, i32
  }
  func.func @transform_6(%arg0: i32) -> i32 {
    %c0_i32 = arith.constant 0 : i32
    %c0_i32_0 = arith.constant 0 : i32
    return %c0_i32 : i32
  }
  func.func @transform_7(%arg0: i32) -> (i32, i32) {
    %c0_i32 = arith.constant 0 : i32
    %c0_i32_0 = arith.constant 0 : i32
    return %arg0, %c0_i32 : i32, i32
  }
}

</mosaic_0001>

<bundles_post_ra>
// kernel: tpu_custom_call.1
= control target key start
LH: loop header
LB: loop body
LE: loop exit
PB: predicated region body
PF: predicated region fallthrough
CT: control target
= control target key end

     0   :  { %v266_v0 = vmov 0.0|0.0   ;;  %vm267_vm0 = vmmov 0   ;;  %v268_v4 = vmov 0.0   ;;  %vm39_vm1 = vcmask 261120   ;;  %s345_s1 = inlined_call_operand.vmem [shape: f32[32,16], index: 1, kind: input, shape index: {}]   ;;  %s346_s0 = inlined_call_operand.vmem [shape: f32[8,32], index: 0, kind: input, shape index: {}]   ;;  %s347_s3 = inlined_call_operand.vmem [shape: f32[16,8], index: 3, kind: input, shape index: {}]   ;;  %s348_s2 = inlined_call_operand.vmem [shape: f32[1,16], index: 2, kind: input, shape index: {}]   ;;  %s349_s4 = inlined_call_operand.vmem [shape: f32[1,8], index: 4, kind: input, shape index: {}]   ;;  %s350_s5 = inlined_call_operand.vmem [shape: f32[1,8], index: 5, kind: input, shape index: {}]   ;;  %s351_s6 = inlined_call_operand.<no memory space> [shape: f32[1], index: 6, kind: input, shape index: {}]   ;;  %s352_s7 = inlined_call_operand.vmem [shape: f32[8,1], index: 7, kind: output, shape index: {}]  }
   0x1   :  { %254 = vmatprep.subr.bf16.mxu0 %v266_v0  ;;  %v28_v1 = vld [vmem:[%s345_s1] sm:$0xff]  ;;  %v29_v2 = vld [vmem:[%s345_s1 + $0x8] sm:$0xff]  ;;  %v30_v3 = vld [vmem:[%s345_s1 + $0x10] sm:$0xff]  ;;  %244 = vmatprep.mubr.msk.f32.mxu0 %vm267_vm0, %v268_v4  ;;  %vm125_vm3 = vcmask 130048   ;;  %vm210_vm5 = vcmask 64512   ;;  %v215_v27 = vstv %s351_s6  ;;  %vm217_vm6 = vcmask 7168  }
   0x2   :  { %v255_v5 = vpack.c.bf16 %v29_v2, %v28_v1  ;;  %v31_v6 = vld [vmem:[%s345_s1 + $0x18] sm:$0xff]  ;;  %260 = vmatprep.subr.bf16.mxu1 %v266_v0  ;;  %251 = vmatprep.mubr.msk.f32.mxu1 %vm267_vm0, %v268_v4  ;;  %v27_v8 = vld [vmem:[%s346_s0] sm:$0xff]  ;;  %v117_v10 = vld [vmem:[%s347_s3 + $0x8] sm:$0xff] }
   0x3   :  { %v258_v7 = vpack.c.bf16 %v31_v6, %v30_v3  ;;  %v116_v9 = vld [vmem:[%s347_s3] sm:$0xff] }
   0x4   :  { %256 = vmatpush3.bf16.msra.mxu0 %v255_v5  ;;  %v261_v11 = vpack.c.bf16 %v117_v10, %v116_v9  ;;  %v223_v12 = vld [vmem:[%s348_s2] ss:$0 sm:$0xff] }
   0x5   :  { %257 = vmatprep.subr.bf16.mxu0 %v266_v0  ;;  %v225_v18 = vld [vmem:[%s349_s4] ss:$0 sm:$0xff] }
   0x6   :  { %262 = vmatpush3.bf16.msra.mxu1 %v261_v11  ;;  %v227_v23 = vld [vmem:[%s350_s5] ss:$0 sm:$0xff] }
   0x8   :  { %259 = vmatpush3.bf16.msra.mxu0 %v258_v7 }
   0xb   :  { %245 = vmatmul.mubr.msk.f32.vlgmr.msra.gmra.mrb[0].mxu0 %vm39_vm1, %v27_v8 }
  0xde   :  { %v109_v13 = vpop.f32.mrb[0].mxu0 }
  0xdf   :  { %v110_v14 = vadd.f32 %v223_v12, %v109_v13  ;;  %v246_v15 = vpop.f32.mrb[1].mxu0 }
  0xe1   :  { %vm113_vm2 = vcmp.gt.f32.partialorder %v110_v14, 0.0  ;;  %v114_v16 = vmul.f32 0.01, %v110_v14 }
  0xe3   :  { %v115_v17 = vsel %vm113_vm2, %v110_v14, %v114_v16 }
  0xe4   :  { %252 = vmatmul.mubr.msk.f32.vlgmr.msra.gmra.mrb[0].mxu1 %vm125_vm3, %v115_v17 }
 0x1b7   :  { %v195_v19 = vpop.f32.mrb[0].mxu1 }
 0x1b8   :  { %v196_v20 = vadd.f32 %v225_v18, %v195_v19  ;;  %v253_v21 = vpop.f32.mrb[1].mxu1 }
 0x1ba   :  { %v200_v22 = vmul.f32 0.01, %v196_v20  ;;  %vm199_vm4 = vcmp.gt.f32.partialorder %v196_v20, 0.0 }
 0x1bc   :  { %v201_v24 = vsel %vm199_vm4, %v196_v20, %v200_v22 }
 0x1bd   :  { %v209_v25 = vmul.f32 %v227_v23, %v201_v24 }
 0x1bf   :  { %v211_v26 = vsel %vm210_vm5, %v209_v25, 0.0 }
 0x1c0   :  { %212 = vadd.xlane.f32.xlu0 %v211_v26 }
 0x24d   :  { %v213_v28 = vpop.xlane.xlu0 %212 }
 0x24e   :  { %v216_v29 = vadd.f32 %v215_v27, %v213_v28 }
 0x250   :  { %218 = vst.msk [vmem:[%s352_s7] sm:$0xff] %vm217_vm6, %v216_v29 }

</bundles_post_ra>
